<compile_context>
chip_gen: v7x
topology: tpu7x:2x2x1
jax: 0.10.0
libtpu: 0.0.40
codegen_flags: <defaults>
</compile_context>

<pallas_src>
import functools

import jax
import jax.numpy as jnp
from jax.experimental import pallas as pl
from jax.experimental.pallas import tpu as pltpu

_NEG_INF = -1e30


def _pick_tile(total, desired):
    """Largest tile <= desired that divides `total` (falls back to `total`)."""
    for t in (desired, 512, 256, 128, 64, 32, 16, 8):
        if t <= total and total % t == 0:
            return t
    return total


# --------------------------------------------------------------------------- #
# Fused attention block:
#   LayerNorm -> fused QKV matmul -> per-head causal softmax-attention ->
#   single (T,C)x(C,C) out-projection -> residual add.
# One grid step per batch element; all heads processed in-kernel.
# --------------------------------------------------------------------------- #
def _attn_block_kernel(x_ref, g_ref, b_ref, wqkv_ref, wo_ref, bo_ref,
                       y_ref, *maybe_p, n_head, head_dim, scale, emit_probs):
    p_ref = maybe_p[0] if emit_probs else None
    x = x_ref[0].astype(jnp.float32)                       # (T, C)
    t = x.shape[0]
    c = n_head * head_dim

    # LayerNorm in f32 on the VPU.
    mean = jnp.mean(x, axis=-1, keepdims=True)
    var = jnp.mean((x - mean) ** 2, axis=-1, keepdims=True)
    h = (x - mean) * jax.lax.rsqrt(var + 1e-5) * g_ref[...] + b_ref[...]

    # Single fused QKV projection (bf16 in, f32 MXU accumulate).
    qkv = jnp.dot(h.astype(jnp.bfloat16), wqkv_ref[...],
                  preferred_element_type=jnp.float32)      # (T, 3C)

    row = jax.lax.broadcasted_iota(jnp.int32, (t, t), 0)
    col = jax.lax.broadcasted_iota(jnp.int32, (t, t), 1)
    causal = col <= row

    # Per-head attention.  The 1/sqrt(D) scale is folded into q (T*D mults,
    # not T*T per head); scores contract on the last dims (no explicit k^T).
    # TODO(synk): the per-head lane slices of `qkv` are only 128-aligned when
    # head_dim % 128 == 0; fully removing that relayout needs a head grid axis
    # with DMA-level splitting, which is not worthwhile at these sizes.
    ctx_parts = []
    for hh in range(n_head):                               # short static unroll
        lo = hh * head_dim
        hi = lo + head_dim
        qh = (qkv[:, lo:hi] * scale).astype(jnp.bfloat16)
        kh = qkv[:, c + lo:c + hi].astype(jnp.bfloat16)
        vh = qkv[:, 2 * c + lo:2 * c + hi].astype(jnp.bfloat16)
        s = jax.lax.dot_general(qh, kh, (((1,), (1,)), ((), ())),
                                preferred_element_type=jnp.float32)  # (T, T)
        s = jnp.where(causal, s, _NEG_INF)
        m = jnp.max(s, axis=-1, keepdims=True)
        e = jnp.exp(s - m)
        p = e / jnp.sum(e, axis=-1, keepdims=True)         # exact softmax
        ctx_parts.append(jnp.dot(p.astype(jnp.bfloat16), vh,
                                 preferred_element_type=jnp.float32))
        if emit_probs:
            p_ref[0, hh] = p.astype(p_ref.dtype)

    # ONE full-K output projection on the MXU + residual (f32 accumulate).
    ctx = jnp.concatenate(ctx_parts, axis=-1)              # (T, C)
    y = x + jnp.dot(ctx.astype(jnp.bfloat16), wo_ref[...],
                    preferred_element_type=jnp.float32) + bo_ref[...]
    y_ref[0] = y.astype(y_ref.dtype)


def attention_block(x, g, b, wqkv, wo, bo, n_head, emit_probs):
    B, T, C = x.shape
    D = C // n_head
    x_spec = pl.BlockSpec((1, T, C), lambda i: (i, 0, 0))
    y_spec = pl.BlockSpec((1, T, C), lambda i: (i, 0, 0))

    def rep(arr):  # weight / param resident across all grid steps
        return pl.BlockSpec(arr.shape, lambda i: (0, 0))

    kernel = functools.partial(_attn_block_kernel, n_head=n_head, head_dim=D,
                               scale=float(D) ** -0.5, emit_probs=emit_probs)
    if emit_probs:
        # Probs emitted in bf16: halves the (1,H,T,T) block's VMEM/writeback.
        out_shape = (jax.ShapeDtypeStruct((B, T, C), jnp.bfloat16),
                     jax.ShapeDtypeStruct((B, n_head, T, T), jnp.bfloat16))
        out_specs = (y_spec,
                     pl.BlockSpec((1, n_head, T, T), lambda i: (i, 0, 0, 0)))
    else:
        out_shape = jax.ShapeDtypeStruct((B, T, C), jnp.bfloat16)
        out_specs = y_spec

    # TODO(synk): for tiny B on v7x a second (query-tile) parallel grid axis
    # would keep both TensorCores busy; omitted here since it would recompute
    # the LN/QKV projection per query tile.
    return pl.pallas_call(
        kernel,
        grid=(B,),
        in_specs=[x_spec, rep(g), rep(b), rep(wqkv), rep(wo), rep(bo)],
        out_specs=out_specs,
        out_shape=out_shape,
        compiler_params=pltpu.CompilerParams(
            dimension_semantics=("parallel",),
            vmem_limit_bytes=64 * 1024 * 1024),
    )(x, g, b, wqkv, wo, bo)


# --------------------------------------------------------------------------- #
# Fused MLP block: LayerNorm -> linear + ReLU -> linear -> residual add,
# tiled over flattened (B*T) rows.  Output carried in bf16.
# --------------------------------------------------------------------------- #
def _mlp_block_kernel(x_ref, g_ref, b_ref, w1_ref, b1_ref, w2_ref, b2_ref, y_ref):
    x = x_ref[...].astype(jnp.float32)                     # (tm, C)
    mean = jnp.mean(x, axis=-1, keepdims=True)
    var = jnp.mean((x - mean) ** 2, axis=-1, keepdims=True)
    h = (x - mean) * jax.lax.rsqrt(var + 1e-5) * g_ref[...] + b_ref[...]
    h1 = jnp.dot(h.astype(jnp.bfloat16), w1_ref[...],
                 preferred_element_type=jnp.float32) + b1_ref[...]
    h1 = jnp.maximum(h1, 0.0)                              # ReLU fused in epilogue
    h2 = jnp.dot(h1.astype(jnp.bfloat16), w2_ref[...],
                 preferred_element_type=jnp.float32) + b2_ref[...]
    y_ref[...] = (x + h2).astype(y_ref.dtype)              # residual fused


def mlp_block(x2d, g, b, w1, b1, w2, b2, *, tm=512):
    M, C = x2d.shape
    tm = _pick_tile(M, tm)
    row_spec = pl.BlockSpec((tm, C), lambda i: (i, 0))

    def rep(arr):
        return pl.BlockSpec(arr.shape, lambda i: (0, 0))

    return pl.pallas_call(
        _mlp_block_kernel,
        grid=(pl.cdiv(M, tm),),
        in_specs=[row_spec, rep(g), rep(b), rep(w1), rep(b1), rep(w2), rep(b2)],
        out_specs=row_spec,
        out_shape=jax.ShapeDtypeStruct((M, C), jnp.bfloat16),
        compiler_params=pltpu.CompilerParams(
            dimension_semantics=("parallel",),
            vmem_limit_bytes=64 * 1024 * 1024),
    )(x2d, g, b, w1, b1, w2, b2)


# --------------------------------------------------------------------------- #
# Fused final LayerNorm + lm_head + cross-entropy.
# Grid = (row tiles [parallel], vocab tiles [arbitrary]); online logsumexp so
# the (M, V) logits never materialize in HBM.  Vocab padded to a lane-dense
# multiple of 512 and masked in-kernel.  Per-row losses are emitted and
# mean-reduced by a tiny XLA op.
# --------------------------------------------------------------------------- #
def _lmhead_xent_kernel(x_ref, g_ref, b_ref, w_ref, bv_ref, tgt_ref, loss_ref,
                        h_sc, m_sc, l_sc, t_sc, *, vocab_size, tile_v):
    vi = pl.program_id(1)

    @pl.when(vi == 0)
    def _():
        x = x_ref[...].astype(jnp.float32)
        mean = jnp.mean(x, axis=-1, keepdims=True)
        var = jnp.mean((x - mean) ** 2, axis=-1, keepdims=True)
        h_sc[...] = (x - mean) * jax.lax.rsqrt(var + 1e-5) * g_ref[...] + b_ref[...]
        m_sc[...] = jnp.full_like(m_sc, _NEG_INF)
        l_sc[...] = jnp.zeros_like(l_sc)
        t_sc[...] = jnp.zeros_like(t_sc)

    logits = jnp.dot(h_sc[...].astype(jnp.bfloat16), w_ref[...],
                     preferred_element_type=jnp.float32) + bv_ref[...]  # (tm,tv)
    col = jax.lax.broadcasted_iota(jnp.int32, logits.shape, 1) + vi * tile_v
    logits = jnp.where(col < vocab_size, logits, _NEG_INF)   # mask padded vocab

    m_prev = m_sc[...]
    m_new = jnp.maximum(m_prev, jnp.max(logits, axis=-1, keepdims=True))
    l_sc[...] = l_sc[...] * jnp.exp(m_prev - m_new) + jnp.sum(
        jnp.exp(logits - m_new), axis=-1, keepdims=True)
    m_sc[...] = m_new
    # TODO(synk): the targets block is (tm, 1) int32 (lane-padded); a fully
    # lane-dense layout needs an in-kernel (1,tm)->(tm,1) relayout.
    t_sc[...] = t_sc[...] + jnp.sum(
        jnp.where(col == tgt_ref[...], logits, 0.0), axis=-1, keepdims=True)

    @pl.when(vi == pl.num_programs(1) - 1)
    def _():
        loss_ref[...] = m_sc[...] + jnp.log(l_sc[...]) - t_sc[...]   # (tm, 1)


def lm_head_cross_entropy(x2d, g, b, w_lm, b_lm, targets, vocab_size, *,
                          tm=256, tile_v=512):
    M, C = x2d.shape
    Vp = w_lm.shape[1]
    tm = _pick_tile(M, tm)
    tile_v = _pick_tile(Vp, tile_v)
    per_row = pl.pallas_call(
        functools.partial(_lmhead_xent_kernel, vocab_size=vocab_size,
                          tile_v=tile_v),
        grid=(M // tm, Vp // tile_v),
        in_specs=[pl.BlockSpec((tm, C), lambda r, v: (r, 0)),
                  pl.BlockSpec((1, C), lambda r, v: (0, 0)),
                  pl.BlockSpec((1, C), lambda r, v: (0, 0)),
                  pl.BlockSpec((C, tile_v), lambda r, v: (0, v)),
                  pl.BlockSpec((1, tile_v), lambda r, v: (0, v)),
                  pl.BlockSpec((tm, 1), lambda r, v: (r, 0))],
        out_specs=pl.BlockSpec((tm, 1), lambda r, v: (r, 0)),
        out_shape=jax.ShapeDtypeStruct((M, 1), jnp.float32),
        scratch_shapes=[pltpu.VMEM((tm, C), jnp.float32),
                        pltpu.VMEM((tm, 1), jnp.float32),
                        pltpu.VMEM((tm, 1), jnp.float32),
                        pltpu.VMEM((tm, 1), jnp.float32)],
        compiler_params=pltpu.CompilerParams(
            dimension_semantics=("parallel", "arbitrary"),
            vmem_limit_bytes=64 * 1024 * 1024),
    )(x2d, g, b, w_lm, b_lm, targets)
    return jnp.mean(per_row)       # tiny XLA reduce over (M, 1) partial losses


# ------------------------------- model glue -------------------------------- #

def init_params(key, vocab_size, n_embd, block_size, n_layer, n_head):
    keys = jax.random.split(key, 3 + n_layer)
    C = n_embd

    def nrm(k, shape, std=0.02):
        return jax.random.normal(k, shape, jnp.float32) * std

    # lm_head padded to a multiple of 512 lanes so tile_v=512 divides evenly.
    vocab_pad = ((vocab_size + 511) // 512) * 512
    w_lm = jnp.zeros((C, vocab_pad), jnp.float32)
    w_lm = w_lm.at[:, :vocab_size].set(nrm(keys[2], (C, vocab_size)))

    params = {
        "n_head": n_head,
        "vocab_size": vocab_size,
        "tok_emb": nrm(keys[0], (vocab_size, C)),
        "pos_emb": nrm(keys[1], (block_size, C)),
        "lnf_g": jnp.ones((1, C), jnp.float32),
        "lnf_b": jnp.zeros((1, C), jnp.float32),
        "w_lm": w_lm.astype(jnp.bfloat16),
        "b_lm": jnp.zeros((1, vocab_pad), jnp.float32),
        "blocks": [],
    }
    for li in range(n_layer):
        lk = jax.random.split(keys[3 + li], 4)
        params["blocks"].append({
            "ln1_g": jnp.ones((1, C), jnp.float32),
            "ln1_b": jnp.zeros((1, C), jnp.float32),
            "wqkv": nrm(lk[0], (C, 3 * C)).astype(jnp.bfloat16),  # q/k/v bias-free
            "wo": nrm(lk[1], (C, C)).astype(jnp.bfloat16),
            "bo": jnp.zeros((1, C), jnp.float32),
            "ln2_g": jnp.ones((1, C), jnp.float32),
            "ln2_b": jnp.zeros((1, C), jnp.float32),
            "w1": nrm(lk[2], (C, 4 * C)).astype(jnp.bfloat16),
            "b1": jnp.zeros((1, 4 * C), jnp.float32),
            "w2": nrm(lk[3], (4 * C, C)).astype(jnp.bfloat16),
            "b2": jnp.zeros((1, C), jnp.float32),
        })
    return params


def language_model_forward(params, idx, target=None):
    B, T = idx.shape
    C = params["tok_emb"].shape[1]
    n_head = params["n_head"]

    # TODO(synk): token-embedding gather stays in XLA; a Pallas DMA-gather is
    # not worthwhile at these sizes.
    x = jnp.take(params["tok_emb"], idx, axis=0) + params["pos_emb"][:T]  # (B,T,C)
    x = x.astype(jnp.bfloat16)          # residual stream carried in bf16

    att_map = None
    n_layer = len(params["blocks"])
    for li, lp in enumerate(params["blocks"]):
        emit_probs = (li == n_layer - 1)   # only the last layer returns probs
        if emit_probs:
            x, att_map = attention_block(x, lp["ln1_g"], lp["ln1_b"], lp["wqkv"],
                                         lp["wo"], lp["bo"], n_head, True)
        else:
            x = attention_block(x, lp["ln1_g"], lp["ln1_b"], lp["wqkv"],
                                lp["wo"], lp["bo"], n_head, False)
        x2d = mlp_block(x.reshape(B * T, C), lp["ln2_g"], lp["ln2_b"],
                        lp["w1"], lp["b1"], lp["w2"], lp["b2"])
        x = x2d.reshape(B, T, C)

    if target is None:
        # logits are not part of the module's return value; skip lm_head entirely.
        return jnp.float32(0.0), att_map

    loss = lm_head_cross_entropy(
        x.reshape(B * T, C), params["lnf_g"], params["lnf_b"],
        params["w_lm"], params["b_lm"],
        target.reshape(B * T, 1).astype(jnp.int32),
        vocab_size=params["vocab_size"])
    return loss, att_map


# ----------------------------------- main ----------------------------------- #

if __name__ == "__main__":
    vocab_size, n_embd, block_size, n_layer, n_head = 65, 32, 8, 2, 4
    B, T = 2, block_size

    key = jax.random.PRNGKey(0)
    pkey, xkey, tkey = jax.random.split(key, 3)

    params = init_params(pkey, vocab_size, n_embd, block_size, n_layer, n_head)
    idx = jax.random.randint(xkey, (B, T), 0, vocab_size, dtype=jnp.int32)
    target = jax.random.randint(tkey, (B, T), 0, vocab_size, dtype=jnp.int32)

    loss, att_map = language_model_forward(params, idx, target)
    jax.block_until_ready((loss, att_map))

    assert att_map.shape == (B, n_head, T, T)
    assert bool(jnp.isfinite(loss))
    print("KERNEL_OK")
</pallas_src>

<mosaic_0001>
module attributes {stable_mosaic.version = 11 : i64} {
  func.func @_attn_block_kernel(%arg0: i32, %arg1: memref<1x8x32xbf16, #tpu.memory_space<vmem>>, %arg2: memref<1x32xf32, #tpu.memory_space<vmem>>, %arg3: memref<1x32xf32, #tpu.memory_space<vmem>>, %arg4: memref<32x96xbf16, #tpu.memory_space<vmem>>, %arg5: memref<32x32xbf16, #tpu.memory_space<vmem>>, %arg6: memref<1x32xf32, #tpu.memory_space<vmem>>, %arg7: memref<1x8x32xbf16, #tpu.memory_space<vmem>>) attributes {dimension_semantics = [#tpu.dimension_semantics<parallel>], iteration_bounds = array<i64: 2>, scalar_prefetch = 0 : i64, scratch_operands = 0 : i64, tpu.core_type = #tpu.core_type<tc>, window_params = [{transform_indices = @transform_0, window_bounds = array<i64: 1, 8, 32>}, {pipeline_mode = #tpu.pipeline_mode<synchronous>, transform_indices = @transform_1, window_bounds = array<i64: 1, 32>}, {pipeline_mode = #tpu.pipeline_mode<synchronous>, transform_indices = @transform_2, window_bounds = array<i64: 1, 32>}, {pipeline_mode = #tpu.pipeline_mode<synchronous>, transform_indices = @transform_3, window_bounds = array<i64: 32, 96>}, {pipeline_mode = #tpu.pipeline_mode<synchronous>, transform_indices = @transform_4, window_bounds = array<i64: 32, 32>}, {pipeline_mode = #tpu.pipeline_mode<synchronous>, transform_indices = @transform_5, window_bounds = array<i64: 1, 32>}, {transform_indices = @transform_6, window_bounds = array<i64: 1, 8, 32>}]} {
    %c0 = arith.constant 0 : index
    %c0_0 = arith.constant 0 : index
    %c0_1 = arith.constant 0 : index
    %0 = vector.load %arg1[%c0, %c0_0, %c0_1] : memref<1x8x32xbf16, #tpu.memory_space<vmem>>, vector<1x8x32xbf16>
    %1 = vector.shape_cast %0 : vector<1x8x32xbf16> to vector<8x32xbf16>
    %2 = arith.extf %1 : vector<8x32xbf16> to vector<8x32xf32>
    %cst = arith.constant dense<0.000000e+00> : vector<8xf32>
    %3 = vector.multi_reduction <add>, %2, %cst [1] : vector<8x32xf32> to vector<8xf32>
    %4 = vector.shape_cast %3 : vector<8xf32> to vector<8x1xf32>
    %cst_2 = arith.constant 3.200000e+01 : f32
    %5 = vector.broadcast %cst_2 : f32 to vector<8x1xf32>
    %6 = arith.divf %4, %5 : vector<8x1xf32>
    %7 = vector.broadcast %6 : vector<8x1xf32> to vector<8x32xf32>
    %8 = arith.subf %2, %7 : vector<8x32xf32>
    %9 = arith.mulf %8, %8 : vector<8x32xf32>
    %cst_3 = arith.constant dense<0.000000e+00> : vector<8xf32>
    %10 = vector.multi_reduction <add>, %9, %cst_3 [1] : vector<8x32xf32> to vector<8xf32>
    %11 = vector.shape_cast %10 : vector<8xf32> to vector<8x1xf32>
    %cst_4 = arith.constant 3.200000e+01 : f32
    %12 = vector.broadcast %cst_4 : f32 to vector<8x1xf32>
    %13 = arith.divf %11, %12 : vector<8x1xf32>
    %14 = vector.broadcast %6 : vector<8x1xf32> to vector<8x32xf32>
    %15 = arith.subf %2, %14 : vector<8x32xf32>
    %cst_5 = arith.constant 9.99999974E-6 : f32
    %16 = vector.broadcast %cst_5 : f32 to vector<8x1xf32>
    %17 = arith.addf %13, %16 : vector<8x1xf32>
    %18 = math.rsqrt %17 : vector<8x1xf32>
    %19 = vector.broadcast %18 : vector<8x1xf32> to vector<8x32xf32>
    %20 = arith.mulf %15, %19 : vector<8x32xf32>
    %c0_6 = arith.constant 0 : index
    %c0_7 = arith.constant 0 : index
    %21 = vector.load %arg2[%c0_6, %c0_7] : memref<1x32xf32, #tpu.memory_space<vmem>>, vector<1x32xf32>
    %22 = vector.broadcast %21 : vector<1x32xf32> to vector<8x32xf32>
    %23 = arith.mulf %20, %22 : vector<8x32xf32>
    %c0_8 = arith.constant 0 : index
    %c0_9 = arith.constant 0 : index
    %24 = vector.load %arg3[%c0_8, %c0_9] : memref<1x32xf32, #tpu.memory_space<vmem>>, vector<1x32xf32>
    %25 = vector.broadcast %24 : vector<1x32xf32> to vector<8x32xf32>
    %26 = arith.addf %23, %25 : vector<8x32xf32>
    %27 = arith.truncf %26 : vector<8x32xf32> to vector<8x32xbf16>
    %c0_10 = arith.constant 0 : index
    %c0_11 = arith.constant 0 : index
    %28 = vector.load %arg4[%c0_10, %c0_11] : memref<32x96xbf16, #tpu.memory_space<vmem>>, vector<32x96xbf16>
    %cst_12 = arith.constant dense<0.000000e+00> : vector<8x96xf32>
    %29 = tpu.matmul %27, %28, %cst_12 {dimension_numbers = #tpu.dot_dimension_numbers<[1], [0], [0], [1], [0, 0, 1, 1], [], []>} : vector<8x32xbf16>, vector<32x96xbf16>, vector<8x96xf32> -> vector<8x96xf32>
    %30 = tpu.iota {dimensions = array<i32: 0>} : vector<8x8xi32>
    %31 = tpu.iota {dimensions = array<i32: 1>} : vector<8x8xi32>
    %32 = arith.cmpi sle, %31, %30 : vector<8x8xi32>
    %33 = vector.extract_strided_slice %29 {offsets = [0, 0], sizes = [8, 8], strides = [1, 1]} : vector<8x96xf32> to vector<8x8xf32>
    %cst_13 = arith.constant 0.353553385 : f32
    %34 = vector.broadcast %cst_13 : f32 to vector<8x8xf32>
    %35 = arith.mulf %33, %34 : vector<8x8xf32>
    %36 = arith.truncf %35 : vector<8x8xf32> to vector<8x8xbf16>
    %37 = vector.extract_strided_slice %29 {offsets = [0, 32], sizes = [8, 8], strides = [1, 1]} : vector<8x96xf32> to vector<8x8xf32>
    %38 = arith.truncf %37 : vector<8x8xf32> to vector<8x8xbf16>
    %39 = vector.extract_strided_slice %29 {offsets = [0, 64], sizes = [8, 8], strides = [1, 1]} : vector<8x96xf32> to vector<8x8xf32>
    %40 = arith.truncf %39 : vector<8x8xf32> to vector<8x8xbf16>
    %cst_14 = arith.constant dense<0.000000e+00> : vector<8x8xf32>
    %41 = tpu.matmul %36, %38, %cst_14 {dimension_numbers = #tpu.dot_dimension_numbers<[1], [1], [0], [0], [0, 0, 1, 0], [], []>} : vector<8x8xbf16>, vector<8x8xbf16>, vector<8x8xf32> -> vector<8x8xf32>
    %cst_15 = arith.constant -1.000000e+30 : f32
    %42 = vector.broadcast %cst_15 : f32 to vector<8x8xf32>
    %43 = arith.select %32, %41, %42 : vector<8x8xi1>, vector<8x8xf32>
    %cst_16 = arith.constant dense<0xFF800000> : vector<8xf32>
    %44 = vector.multi_reduction <maximumf>, %43, %cst_16 [1] : vector<8x8xf32> to vector<8xf32>
    %45 = vector.shape_cast %44 : vector<8xf32> to vector<8x1xf32>
    %46 = vector.broadcast %45 : vector<8x1xf32> to vector<8x8xf32>
    %47 = arith.subf %43, %46 : vector<8x8xf32>
    %48 = math.exp %47 : vector<8x8xf32>
    %cst_17 = arith.constant dense<0.000000e+00> : vector<8xf32>
    %49 = vector.multi_reduction <add>, %48, %cst_17 [1] : vector<8x8xf32> to vector<8xf32>
    %50 = vector.shape_cast %49 : vector<8xf32> to vector<8x1xf32>
    %51 = vector.broadcast %50 : vector<8x1xf32> to vector<8x8xf32>
    %52 = arith.divf %48, %51 : vector<8x8xf32>
    %53 = arith.truncf %52 : vector<8x8xf32> to vector<8x8xbf16>
    %cst_18 = arith.constant dense<0.000000e+00> : vector<8x8xf32>
    %54 = tpu.matmul %53, %40, %cst_18 {dimension_numbers = #tpu.dot_dimension_numbers<[1], [0], [0], [1], [0, 0, 1, 1], [], []>} : vector<8x8xbf16>, vector<8x8xbf16>, vector<8x8xf32> -> vector<8x8xf32>
    %55 = vector.extract_strided_slice %29 {offsets = [0, 8], sizes = [8, 8], strides = [1, 1]} : vector<8x96xf32> to vector<8x8xf32>
    %cst_19 = arith.constant 0.353553385 : f32
    %56 = vector.broadcast %cst_19 : f32 to vector<8x8xf32>
    %57 = arith.mulf %55, %56 : vector<8x8xf32>
    %58 = arith.truncf %57 : vector<8x8xf32> to vector<8x8xbf16>
    %59 = vector.extract_strided_slice %29 {offsets = [0, 40], sizes = [8, 8], strides = [1, 1]} : vector<8x96xf32> to vector<8x8xf32>
    %60 = arith.truncf %59 : vector<8x8xf32> to vector<8x8xbf16>
    %61 = vector.extract_strided_slice %29 {offsets = [0, 72], sizes = [8, 8], strides = [1, 1]} : vector<8x96xf32> to vector<8x8xf32>
    %62 = arith.truncf %61 : vector<8x8xf32> to vector<8x8xbf16>
    %cst_20 = arith.constant dense<0.000000e+00> : vector<8x8xf32>
    %63 = tpu.matmul %58, %60, %cst_20 {dimension_numbers = #tpu.dot_dimension_numbers<[1], [1], [0], [0], [0, 0, 1, 0], [], []>} : vector<8x8xbf16>, vector<8x8xbf16>, vector<8x8xf32> -> vector<8x8xf32>
    %cst_21 = arith.constant -1.000000e+30 : f32
    %64 = vector.broadcast %cst_21 : f32 to vector<8x8xf32>
    %65 = arith.select %32, %63, %64 : vector<8x8xi1>, vector<8x8xf32>
    %cst_22 = arith.constant dense<0xFF800000> : vector<8xf32>
    %66 = vector.multi_reduction <maximumf>, %65, %cst_22 [1] : vector<8x8xf32> to vector<8xf32>
    %67 = vector.shape_cast %66 : vector<8xf32> to vector<8x1xf32>
    %68 = vector.broadcast %67 : vector<8x1xf32> to vector<8x8xf32>
    %69 = arith.subf %65, %68 : vector<8x8xf32>
    %70 = math.exp %69 : vector<8x8xf32>
    %cst_23 = arith.constant dense<0.000000e+00> : vector<8xf32>
    %71 = vector.multi_reduction <add>, %70, %cst_23 [1] : vector<8x8xf32> to vector<8xf32>
    %72 = vector.shape_cast %71 : vector<8xf32> to vector<8x1xf32>
    %73 = vector.broadcast %72 : vector<8x1xf32> to vector<8x8xf32>
    %74 = arith.divf %70, %73 : vector<8x8xf32>
    %75 = arith.truncf %74 : vector<8x8xf32> to vector<8x8xbf16>
    %cst_24 = arith.constant dense<0.000000e+00> : vector<8x8xf32>
    %76 = tpu.matmul %75, %62, %cst_24 {dimension_numbers = #tpu.dot_dimension_numbers<[1], [0], [0], [1], [0, 0, 1, 1], [], []>} : vector<8x8xbf16>, vector<8x8xbf16>, vector<8x8xf32> -> vector<8x8xf32>
    %77 = vector.extract_strided_slice %29 {offsets = [0, 16], sizes = [8, 8], strides = [1, 1]} : vector<8x96xf32> to vector<8x8xf32>
    %cst_25 = arith.constant 0.353553385 : f32
    %78 = vector.broadcast %cst_25 : f32 to vector<8x8xf32>
    %79 = arith.mulf %77, %78 : vector<8x8xf32>
    %80 = arith.truncf %79 : vector<8x8xf32> to vector<8x8xbf16>
    %81 = vector.extract_strided_slice %29 {offsets = [0, 48], sizes = [8, 8], strides = [1, 1]} : vector<8x96xf32> to vector<8x8xf32>
    %82 = arith.truncf %81 : vector<8x8xf32> to vector<8x8xbf16>
    %83 = vector.extract_strided_slice %29 {offsets = [0, 80], sizes = [8, 8], strides = [1, 1]} : vector<8x96xf32> to vector<8x8xf32>
    %84 = arith.truncf %83 : vector<8x8xf32> to vector<8x8xbf16>
    %cst_26 = arith.constant dense<0.000000e+00> : vector<8x8xf32>
    %85 = tpu.matmul %80, %82, %cst_26 {dimension_numbers = #tpu.dot_dimension_numbers<[1], [1], [0], [0], [0, 0, 1, 0], [], []>} : vector<8x8xbf16>, vector<8x8xbf16>, vector<8x8xf32> -> vector<8x8xf32>
    %cst_27 = arith.constant -1.000000e+30 : f32
    %86 = vector.broadcast %cst_27 : f32 to vector<8x8xf32>
    %87 = arith.select %32, %85, %86 : vector<8x8xi1>, vector<8x8xf32>
    %cst_28 = arith.constant dense<0xFF800000> : vector<8xf32>
    %88 = vector.multi_reduction <maximumf>, %87, %cst_28 [1] : vector<8x8xf32> to vector<8xf32>
    %89 = vector.shape_cast %88 : vector<8xf32> to vector<8x1xf32>
    %90 = vector.broadcast %89 : vector<8x1xf32> to vector<8x8xf32>
    %91 = arith.subf %87, %90 : vector<8x8xf32>
    %92 = math.exp %91 : vector<8x8xf32>
    %cst_29 = arith.constant dense<0.000000e+00> : vector<8xf32>
    %93 = vector.multi_reduction <add>, %92, %cst_29 [1] : vector<8x8xf32> to vector<8xf32>
    %94 = vector.shape_cast %93 : vector<8xf32> to vector<8x1xf32>
    %95 = vector.broadcast %94 : vector<8x1xf32> to vector<8x8xf32>
    %96 = arith.divf %92, %95 : vector<8x8xf32>
    %97 = arith.truncf %96 : vector<8x8xf32> to vector<8x8xbf16>
    %cst_30 = arith.constant dense<0.000000e+00> : vector<8x8xf32>
    %98 = tpu.matmul %97, %84, %cst_30 {dimension_numbers = #tpu.dot_dimension_numbers<[1], [0], [0], [1], [0, 0, 1, 1], [], []>} : vector<8x8xbf16>, vector<8x8xbf16>, vector<8x8xf32> -> vector<8x8xf32>
    %99 = vector.extract_strided_slice %29 {offsets = [0, 24], sizes = [8, 8], strides = [1, 1]} : vector<8x96xf32> to vector<8x8xf32>
    %cst_31 = arith.constant 0.353553385 : f32
    %100 = vector.broadcast %cst_31 : f32 to vector<8x8xf32>
    %101 = arith.mulf %99, %100 : vector<8x8xf32>
    %102 = arith.truncf %101 : vector<8x8xf32> to vector<8x8xbf16>
    %103 = vector.extract_strided_slice %29 {offsets = [0, 56], sizes = [8, 8], strides = [1, 1]} : vector<8x96xf32> to vector<8x8xf32>
    %104 = arith.truncf %103 : vector<8x8xf32> to vector<8x8xbf16>
    %105 = vector.extract_strided_slice %29 {offsets = [0, 88], sizes = [8, 8], strides = [1, 1]} : vector<8x96xf32> to vector<8x8xf32>
    %106 = arith.truncf %105 : vector<8x8xf32> to vector<8x8xbf16>
    %cst_32 = arith.constant dense<0.000000e+00> : vector<8x8xf32>
    %107 = tpu.matmul %102, %104, %cst_32 {dimension_numbers = #tpu.dot_dimension_numbers<[1], [1], [0], [0], [0, 0, 1, 0], [], []>} : vector<8x8xbf16>, vector<8x8xbf16>, vector<8x8xf32> -> vector<8x8xf32>
    %cst_33 = arith.constant -1.000000e+30 : f32
    %108 = vector.broadcast %cst_33 : f32 to vector<8x8xf32>
    %109 = arith.select %32, %107, %108 : vector<8x8xi1>, vector<8x8xf32>
    %cst_34 = arith.constant dense<0xFF800000> : vector<8xf32>
    %110 = vector.multi_reduction <maximumf>, %109, %cst_34 [1] : vector<8x8xf32> to vector<8xf32>
    %111 = vector.shape_cast %110 : vector<8xf32> to vector<8x1xf32>
    %112 = vector.broadcast %111 : vector<8x1xf32> to vector<8x8xf32>
    %113 = arith.subf %109, %112 : vector<8x8xf32>
    %114 = math.exp %113 : vector<8x8xf32>
    %cst_35 = arith.constant dense<0.000000e+00> : vector<8xf32>
    %115 = vector.multi_reduction <add>, %114, %cst_35 [1] : vector<8x8xf32> to vector<8xf32>
    %116 = vector.shape_cast %115 : vector<8xf32> to vector<8x1xf32>
    %117 = vector.broadcast %116 : vector<8x1xf32> to vector<8x8xf32>
    %118 = arith.divf %114, %117 : vector<8x8xf32>
    %119 = arith.truncf %118 : vector<8x8xf32> to vector<8x8xbf16>
    %cst_36 = arith.constant dense<0.000000e+00> : vector<8x8xf32>
    %120 = tpu.matmul %119, %106, %cst_36 {dimension_numbers = #tpu.dot_dimension_numbers<[1], [0], [0], [1], [0, 0, 1, 1], [], []>} : vector<8x8xbf16>, vector<8x8xbf16>, vector<8x8xf32> -> vector<8x8xf32>
    %121 = tpu.concatenate %54, %76, %98, %120 in 1 : vector<8x8xf32>, vector<8x8xf32>, vector<8x8xf32>, vector<8x8xf32> -> vector<8x32xf32>
    %122 = arith.truncf %121 : vector<8x32xf32> to vector<8x32xbf16>
    %c0_37 = arith.constant 0 : index
    %c0_38 = arith.constant 0 : index
    %123 = vector.load %arg5[%c0_37, %c0_38] : memref<32x32xbf16, #tpu.memory_space<vmem>>, vector<32x32xbf16>
    %cst_39 = arith.constant dense<0.000000e+00> : vector<8x32xf32>
    %124 = tpu.matmul %122, %123, %cst_39 {dimension_numbers = #tpu.dot_dimension_numbers<[1], [0], [0], [1], [0, 0, 1, 1], [], []>} : vector<8x32xbf16>, vector<32x32xbf16>, vector<8x32xf32> -> vector<8x32xf32>
    %125 = arith.addf %2, %124 : vector<8x32xf32>
    %c0_40 = arith.constant 0 : index
    %c0_41 = arith.constant 0 : index
    %126 = vector.load %arg6[%c0_40, %c0_41] : memref<1x32xf32, #tpu.memory_space<vmem>>, vector<1x32xf32>
    %127 = vector.broadcast %126 : vector<1x32xf32> to vector<8x32xf32>
    %128 = arith.addf %125, %127 : vector<8x32xf32>
    %129 = arith.truncf %128 : vector<8x32xf32> to vector<8x32xbf16>
    %c0_42 = arith.constant 0 : index
    %c0_43 = arith.constant 0 : index
    %c0_44 = arith.constant 0 : index
    %130 = vector.load %arg7[%c0_42, %c0_43, %c0_44] : memref<1x8x32xbf16, #tpu.memory_space<vmem>>, vector<1x8x32xbf16>
    %131 = vector.shape_cast %130 : vector<1x8x32xbf16> to vector<8x32xbf16>
    %132 = vector.shape_cast %129 : vector<8x32xbf16> to vector<1x8x32xbf16>
    tpu.vector_store %arg7[%c0_42, %c0_43, %c0_44], %132 {strides = array<i32>} : memref<1x8x32xbf16, #tpu.memory_space<vmem>>, vector<1x8x32xbf16>,
    return
  }
  func.func @transform_0(%arg0: i32) -> (i32, i32, i32) {
    %c0_i32 = arith.constant 0 : i32
    %c0_i32_0 = arith.constant 0 : i32
    %c0_i32_1 = arith.constant 0 : i32
    return %arg0, %c0_i32, %c0_i32_0 : i32, i32, i32
  }
  func.func @transform_1(%arg0: i32) -> (i32, i32) {
    %c0_i32 = arith.constant 0 : i32
    %c0_i32_0 = arith.constant 0 : i32
    %c0_i32_1 = arith.constant 0 : i32
    return %c0_i32, %c0_i32_0 : i32, i32
  }
  func.func @transform_2(%arg0: i32) -> (i32, i32) {
    %c0_i32 = arith.constant 0 : i32
    %c0_i32_0 = arith.constant 0 : i32
    %c0_i32_1 = arith.constant 0 : i32
    return %c0_i32, %c0_i32_0 : i32, i32
  }
  func.func @transform_3(%arg0: i32) -> (i32, i32) {
    %c0_i32 = arith.constant 0 : i32
    %c0_i32_0 = arith.constant 0 : i32
    %c0_i32_1 = arith.constant 0 : i32
    return %c0_i32, %c0_i32_0 : i32, i32
  }
  func.func @transform_4(%arg0: i32) -> (i32, i32) {
    %c0_i32 = arith.constant 0 : i32
    %c0_i32_0 = arith.constant 0 : i32
    %c0_i32_1 = arith.constant 0 : i32
    return %c0_i32, %c0_i32_0 : i32, i32
  }
  func.func @transform_5(%arg0: i32) -> (i32, i32) {
    %c0_i32 = arith.constant 0 : i32
    %c0_i32_0 = arith.constant 0 : i32
    %c0_i32_1 = arith.constant 0 : i32
    return %c0_i32, %c0_i32_0 : i32, i32
  }
  func.func @transform_6(%arg0: i32) -> (i32, i32, i32) {
    %c0_i32 = arith.constant 0 : i32
    %c0_i32_0 = arith.constant 0 : i32
    %c0_i32_1 = arith.constant 0 : i32
    return %arg0, %c0_i32, %c0_i32_0 : i32, i32, i32
  }
}

</mosaic_0001>

<bundles_post_ra>
// kernel: tpu_custom_call.1
= control target key start
LH: loop header
LB: loop body
LE: loop exit
PB: predicated region body
PF: predicated region fallthrough
CT: control target
= control target key end

     0   :  { %11 = vsyncpa [#allocation3], 0  ;;  %s2063_s0 = inlined_call_operand.hbm [shape: bf16[2,8,32], index: 0, kind: input, shape index: {}]   ;;  %s2064_s1 = inlined_call_operand.hbm [shape: f32[1,32], index: 1, kind: input, shape index: {}]   ;;  %s2065_s2 = inlined_call_operand.hbm [shape: f32[1,32], index: 2, kind: input, shape index: {}]   ;;  %s2066_s3 = inlined_call_operand.hbm [shape: bf16[32,96], index: 3, kind: input, shape index: {}]   ;;  %s2067_s4 = inlined_call_operand.hbm [shape: bf16[32,32], index: 4, kind: input, shape index: {}]   ;;  %s2068_s5 = inlined_call_operand.hbm [shape: f32[1,32], index: 5, kind: input, shape index: {}]   ;;  %s2069_s6 = inlined_call_operand.hbm [shape: bf16[2,8,32], index: 6, kind: output, shape index: {}]  }
   0x1   :  { %13 = vsyncpa [#allocation3 + $0x1], 0 }
   0x2   :  { %14 = vsyncpa [#allocation6], 0 }
   0x3   :  { %15 = vsyncpa [#allocation9], 0 }
   0x4   :  { %16 = vsyncpa [#allocation12], 0 }
   0x5   :  { %17 = vsyncpa [#allocation4], 0 }
   0x6   :  { %19 = vsyncpa [#allocation4 + $0x1], 0  ;;  %s1675_s21 = smov 0   ;;  %s1677_s22 = smov 0  }
   0x7   :  { %s1679_s23 = smov 0   ;;  %s1681_s24 = smov 0  }
   0x8 LB: > { %s1615_s25 = smov [#allocation5]   ;;  %s1696_s27 = sadd.s32 4294967295, %s1613_s24   ;;  %s1613_s24 = sphi %s1681_s24, %s2094_s24   ;;  %s1609_s23 = sphi %s1679_s23, %s2093_s23   ;;  %s1605_s22 = sphi %s1677_s22, %s2092_s22   ;;  %s1601_s21 = sphi %s1675_s21, %s2091_s21  }
   0x9   : > { %s200_s26 = sshll.u32 %s1615_s25, 4  ;;  %p1104_p0 = scmp.ge.s32.totalorder %s1613_s24, 1  ;;  %s1701_s26 = int_to_ptr.vmem [resolvable:$true] %s200_s26 }
   0xa   : > { %p2070_p1 = scmp.eq.s32.totalorder %s1696_s27, 0  ;;  %p187_p2 = scmp.lt.s32.totalorder %s1613_s24, 3 }
   0xb   : > { %s1616_s29 = smov [#allocation8]   ;;  %s1617_s8 = smov [#allocation7]  }
   0xc   : > { %p1703_p3 = pnand %p1104_p0, %p187_p2  ;;  %s221_s30 = sshll.u32 %s1616_s29, 4  ;;  %s1710_s30 = int_to_ptr.vmem [resolvable:$true] %s221_s30 }
   0xd   : > { %s211_s9 = sshll.u32 %s1617_s8, 4  ;;  %s1365_s12 = scalar_lea.hbm %s2064_s1, 16  ;;  %s1718_s9 = int_to_ptr.vmem [resolvable:$true] %s211_s9 }
   0xe   : > { %s2073_s28 = scalar_select %p1703_p3, 1, 0 }
   0xf   : > { %p1252_p5 = pneg %p1703_p3  ;;  %p1366_p7 = scmp.ne.s32.totalorder %s2064_s1, %s1365_s12 }
  0x10   : > { %p1372_p11 = scmp.lt.u32.totalorder %s1365_s12, %s2064_s1 }
  0x11   : > { %p1714_p6 = pnand %p1252_p5, %p2070_p1 }
  0x13   : > { %p1728_p8 = pneg %p1714_p6 }
  0x15   : > { %p1368_p9 = pnand %p1728_p8, %p1366_p7 }
  0x17   : > { %p1369_p10 = pneg %p1368_p9 }
  0x19   : > { %p1374_p12 = pnand %p1372_p11, %p1369_p10 }
  0x1b   : > { %1377 = shalt.err (!%p1374_p12)
}
  0x1c   : > { %s1378_s18 = scalar_lea.vmem %s1701_s26, 16  ;;  %s1385_s19 = scalar_lea.vmem %s1701_s26, 32 }
  0x1d   : > { %p1379_p13 = scmp.ne.s32.totalorder %s1701_s26, %s1378_s18  ;;  %p1386_p5 = scmp.lt.s32.totalorder %s1701_s26, %s1701_s26 }
  0x1e   : > { %p1387_p7 = scmp.lt.s32.totalorder %s1385_s19, %s1378_s18 }
  0x1f   : > { %p1381_p0 = pnand %p1379_p13, %p1728_p8 }
  0x20   : > { %p1388_p9 = por %p1387_p7, %p1386_p5 }
  0x21   : > { %p1382_p2 = pneg %p1381_p0 }
  0x23   : > { %p1389_p4 = pnand %p1388_p9, %p1382_p2 }
  0x25   : > { %1392 = shalt.err (!%p1389_p4)
}
  0x26   : > { %1255 = dma.hbm_to_vmem [thread:$0]  (!%p1714_p6), %s2064_s1, 16, %s1701_s26, [#allocation6]  }
  0x27   : > { %s1393_s10 = scalar_lea.hbm %s2066_s3, 256 }
  0x28   : > { %p1394_p10 = scmp.ne.s32.totalorder %s2066_s3, %s1393_s10  ;;  %p1400_p4 = scmp.lt.u32.totalorder %s1393_s10, %s2066_s3 }
  0x2a   : > { %p1396_p11 = pnand %p1394_p10, %p1728_p8 }
  0x2c   : > { %p1397_p12 = pneg %p1396_p11 }
  0x2e   : > { %p1402_p13 = pnand %p1400_p4, %p1397_p12 }
  0x30   : > { %1405 = shalt.err (!%p1402_p13)
}
  0x31   : > { %s1406_s26 = scalar_lea.vmem %s1710_s30, 256  ;;  %p1414_p7 = scmp.lt.s32.totalorder %s1710_s30, %s1710_s30 }
  0x32   : > { %p1407_p0 = scmp.ne.s32.totalorder %s1710_s30, %s1406_s26  ;;  %p1415_p9 = scmp.lt.s32.totalorder %s1406_s26, %s1406_s26 }
  0x34   : > { %p1409_p2 = pnand %p1407_p0, %p1728_p8  ;;  %p1416_p10 = por %p1415_p9, %p1414_p7 }
  0x36   : > { %p1410_p5 = pneg %p1409_p2 }
  0x38   : > { %p1417_p11 = pnand %p1416_p10, %p1410_p5 }
  0x3a   : > { %1420 = shalt.err (!%p1417_p11)
}
  0x3b   : > { %s1618_s16 = smov 64   ;;  %s1619_s17 = smov 4  }
  0x3c   : > { %1261 = dma.hbm_to_vmem [thread:$0]  (!%p1714_p6), %s2066_s3, 256, %s1710_s30, [#allocation9], %s1618_s16, %s1618_s16, %s1619_s17  }
  0x3d   : > { %s1421_s29 = scalar_lea.hbm %s2065_s2, 16 }
  0x3e   : > { %p1422_p12 = scmp.ne.s32.totalorder %s2065_s2, %s1421_s29  ;;  %p1428_p0 = scmp.lt.u32.totalorder %s1421_s29, %s2065_s2 }
  0x40   : > { %p1424_p4 = pnand %p1422_p12, %p1728_p8 }
  0x42   : > { %p1425_p13 = pneg %p1424_p4 }
  0x44   : > { %p1430_p2 = pnand %p1428_p0, %p1425_p13 }
  0x46   : > { %1433 = shalt.err (!%p1430_p2)
}
  0x47   : > { %s1434_s30 = scalar_lea.vmem %s1718_s9, 16  ;;  %s1441_s13 = scalar_lea.vmem %s1718_s9, 32 }
  0x48   : > { %p1435_p5 = scmp.ne.s32.totalorder %s1718_s9, %s1434_s30  ;;  %p1442_p10 = scmp.lt.s32.totalorder %s1718_s9, %s1718_s9 }
  0x49   : > { %p1443_p11 = scmp.lt.s32.totalorder %s1441_s13, %s1434_s30 }
  0x4a   : > { %p1437_p7 = pnand %p1435_p5, %p1728_p8 }
  0x4b   : > { %p1444_p12 = por %p1443_p11, %p1442_p10 }
  0x4c   : > { %p1438_p9 = pneg %p1437_p7 }
  0x4e   : > { %p1445_p4 = pnand %p1444_p12, %p1438_p9 }
  0x50   : > { %1448 = shalt.err (!%p1445_p4)
}
  0x51   : > { %1258 = dma.hbm_to_vmem [thread:$0]  (!%p1714_p6), %s2065_s2, 16, %s1718_s9, [#allocation6]  }
  0x52   : > { %s1620_s18 = smov [#allocation10]   ;;  %s1621_s20 = smov [#allocation11]  }
  0x53   : > { %s234_s19 = sshll.u32 %s1620_s18, 4  ;;  %s248_s25 = sshll.u32 %s1621_s20, 4  ;;  %s235_s19 = int_to_ptr.vmem [resolvable:$true] %s234_s19  ;;  %s249_s25 = int_to_ptr.vmem [resolvable:$true] %s248_s25 }
  0x54   : > { %s1449_s10 = scalar_lea.hbm %s2067_s4, 256 }
  0x55   : > { %p1450_p13 = scmp.ne.s32.totalorder %s2067_s4, %s1449_s10  ;;  %p1456_p5 = scmp.lt.u32.totalorder %s1449_s10, %s2067_s4 }
  0x57   : > { %p1452_p0 = pnand %p1450_p13, %p1728_p8 }
  0x59   : > { %p1453_p2 = pneg %p1452_p0 }
  0x5b   : > { %p1458_p7 = pnand %p1456_p5, %p1453_p2 }
  0x5d   : > { %1461 = shalt.err (!%p1458_p7)
}
  0x5e   : > { %s1462_s9 = scalar_lea.vmem %s235_s19, 256  ;;  %p1470_p12 = scmp.lt.s32.totalorder %s235_s19, %s235_s19 }
  0x5f   : > { %p1463_p9 = scmp.ne.s32.totalorder %s235_s19, %s1462_s9  ;;  %p1471_p4 = scmp.lt.s32.totalorder %s1462_s9, %s1462_s9 }
  0x61   : > { %p1465_p10 = pnand %p1463_p9, %p1728_p8  ;;  %p1472_p1 = por %p1471_p4, %p1470_p12 }
  0x63   : > { %p1466_p11 = pneg %p1465_p10 }
  0x65   : > { %p1473_p3 = pnand %p1472_p1, %p1466_p11 }
  0x67   : > { %1476 = shalt.err (!%p1473_p3)
}
  0x68   : > { %1264 = dma.hbm_to_vmem [thread:$0]  (!%p1714_p6), %s2067_s4, 256, %s235_s19, [#allocation9], %s1618_s16, %s1618_s16, %s1619_s17  }
  0x69   : > { %s1477_s29 = scalar_lea.hbm %s2068_s5, 16 }
  0x6a   : > { %p1478_p1 = scmp.ne.s32.totalorder %s2068_s5, %s1477_s29  ;;  %p1484_p0 = scmp.lt.u32.totalorder %s1477_s29, %s2068_s5 }
  0x6c   : > { %p1480_p3 = pnand %p1478_p1, %p1728_p8 }
  0x6e   : > { %p1481_p13 = pneg %p1480_p3 }
  0x70   : > { %p1486_p2 = pnand %p1484_p0, %p1481_p13 }
  0x72   : > { %1489 = shalt.err (!%p1486_p2)
}
  0x73   : > { %s1490_s30 = scalar_lea.vmem %s249_s25, 16  ;;  %s1497_s16 = scalar_lea.vmem %s249_s25, 32 }
  0x74   : > { %p1491_p5 = scmp.ne.s32.totalorder %s249_s25, %s1490_s30  ;;  %p1498_p10 = scmp.lt.s32.totalorder %s249_s25, %s249_s25 }
  0x75   : > { %p1499_p11 = scmp.lt.s32.totalorder %s1497_s16, %s1490_s30 }
  0x76   : > { %p1493_p7 = pnand %p1491_p5, %p1728_p8 }
  0x77   : > { %p1500_p12 = por %p1499_p11, %p1498_p10 }
  0x78   : > { %p1494_p9 = pneg %p1493_p7 }
  0x7a   : > { %p1501_p4 = pnand %p1500_p12, %p1494_p9 }
  0x7c   : > { %1504 = shalt.err (!%p1501_p4)
}
  0x7d   : > { %1267 = dma.hbm_to_vmem [thread:$0]  (!%p1714_p6), %s2068_s5, 16, %s249_s25, [#allocation12]  }
  0x7e   : > { %s1103_s15 = sadd.s32 4294967294, %s1613_s24   ;;  %s1841_s7 = sadd.s32 1, %s1613_s24  }
  0x7f   : > { %s32_s13 = sadd.s32 1, %s1609_s23  ;;  %s29_s9 = ssub.s32 %s1613_s24, %s1841_s7 }
  0x80   : > { %p39_p8 = scmp.ne.s32.totalorder %s1609_s23, %s1605_s22  ;;  %p30_p1 = scmp.eq.s32.totalorder %s29_s9, 0 }
  0x81   : > { %p40_p3 = scmp.eq.s32.totalorder %s1613_s24, 0  ;;  %p45_p13 = scmp.ne.s32.totalorder %s1605_s22, %s1601_s21 }
  0x82   : > { %p174_p0 = scmp.eq.s32.totalorder %s1696_s27, 1  ;;  %p2076_p5 = scmp.eq.s32.totalorder %s1696_s27, 0 }
  0x83   : > { %s1853_s14 = scalar_select %p30_p1, %s1609_s23, %s32_s13  }
  0x84   : > { %p41_p2 = por %p40_p3, %p39_p8  ;;  %p1857_p7 = por %p2076_p5, %p45_p13 }
  0x85   : > { %p1861_p6 = por %p174_p0, %p39_p8  ;;  %p180_p9 = scmp.eq.s32.totalorder %s1103_s15, 1 }
  0x86   : > { %p1281_p10 = scmp.lt.s32.totalorder %s1613_s24, 2  ;;  %s259_s18 = sand.u32 1, %s1609_s23  }
  0x87   : > { %s2078_s25 = scalar_select %p1861_p6, 1, 0 }
  0x88   : > { %p1867_p11 = por %p180_p9, %p45_p13  ;;  %s1111_s29 = sshll.u32 %s259_s18, 2 }
  0x89   : > { %s1112_s8 = sshll.u32 %s1613_s24, 6  ;;  %s263_s30 = scalar_lea.vmem [#allocation2], %s1111_s29 }
  0x8a   : > { %s2079_s20 = scalar_select %p1867_p11, 1, 0 }
  0x8b   : > { %s1875_s12 = scalar_lea.hbm %s2063_s0, %s1112_s8  ;;  %s270_s16 = sshll.u32 %s263_s30, 4  ;;  %s1881_s16 = int_to_ptr.vmem [resolvable:$true] %s270_s16 }
  0x8c   : > { %p1877_p12 = pnand %p1281_p10, %p41_p2  ;;  %s260_s19 = scalar_lea.sflag [#allocation3], %s259_s18 }
  0x8d   : > { %s1505_s15 = scalar_lea.hbm %s1875_s12, 64  ;;  %s1510_s29 = scalar_lea.hbm %s2063_s0, 128 }
  0x8e   : > { %p1506_p4 = scmp.ne.s32.totalorder %s1875_s12, %s1505_s15  ;;  %p1507_p8 = pneg %p1877_p12 }
  0x8f   : > { %p1511_p13 = scmp.lt.u32.totalorder %s1875_s12, %s2063_s0  ;;  %p1512_p0 = scmp.lt.u32.totalorder %s1510_s29, %s1505_s15 }
  0x90   : > { %p1508_p1 = pnand %p1507_p8, %p1506_p4  ;;  %p1514_p5 = scmp.lt.u32.totalorder %s1505_s15, %s1875_s12 }
  0x91   : > { %p1513_p2 = por %p1512_p0, %p1511_p13 }
  0x92   : > { %p1509_p3 = pneg %p1508_p1 }
  0x93   : > { %p1515_p9 = por %p1514_p5, %p1513_p2 }
  0x95   : > { %p1516_p10 = pnand %p1515_p9, %p1509_p3 }
  0x97   : > { %1519 = shalt.err (!%p1516_p10)
}
  0x98   : > { %s1520_s18 = scalar_lea.vmem %s1881_s16, 64  ;;  %s1622_s11 = smov [#allocation2]  }
  0x99   : > { %p1521_p4 = scmp.ne.s32.totalorder %s1881_s16, %s1520_s18  ;;  %s1525_s30 = sshll.u32 %s1622_s11, 4  ;;  %s1526_s30 = int_to_ptr.vmem [resolvable:$false] %s1525_s30 }
  0x9a   : > { %s1527_s13 = scalar_lea.vmem %s1526_s30, 128  ;;  %p1528_p6 = scmp.lt.s32.totalorder %s1881_s16, %s1526_s30 }
  0x9b   : > { %p1523_p1 = pnand %p1521_p4, %p1507_p8  ;;  %p1529_p13 = scmp.lt.s32.totalorder %s1527_s13, %s1520_s18 }
  0x9d   : > { %p1524_p11 = pneg %p1523_p1  ;;  %p1530_p0 = por %p1529_p13, %p1528_p6 }
  0x9f   : > { %p1531_p2 = pnand %p1530_p0, %p1524_p11 }
  0xa1   : > { %1534 = shalt.err (!%p1531_p2)
}
  0xa2   : > { %1271 = dma.hbm_to_vmem [thread:$0]  (!%p1877_p12), %s1875_s12, 64, %s1881_s16, %s260_s19  }
  0xa3   : > { %p2081_p3 = scmp.ne.s32.totalorder %s2073_s28, 0 }
  0xa4   : > { %s1911_s15 = sand.u32 (!%p2081_p3), 1, %s1605_s22  }
  0xa5   : > { %279 = sbr.rel (%p2081_p3) target bundleno = 1989 (0x7c5), region = 44  ;;  %s1114_s9 = sshll.u32 (!%p2081_p3), %s1911_s15, 2 }
  0xa6   : > { %s282_s29 = scalar_lea.sflag (!%p2081_p3), [#allocation3], %s1911_s15  ;;  %s285_s8 = scalar_lea.vmem (!%p2081_p3), [#allocation2], %s1114_s9 }
  0xac   : > { %1580 = dma.done.wait (%p1857_p7), %s282_s29, 64  }
  0xad   : > { %1582 = vsyncadd (%p1857_p7), %s282_s29, 4294967232  ;;  %p2082_p6 = scmp.eq.s32.totalorder %s1696_s27, 0 }
  0xaf   : > { %1584 = dma.done.wait (%p2082_p6), [#allocation6], 32   ;;  %p2083_p11 = pmov %p2082_p6 }
  0xb0   : > { %p2084_p12 = pmov %p2082_p6 }
  0xb1   : > { %1586 = vsyncadd (%p2083_p11), [#allocation6], 4294967264 }
  0xb2   : > { %1588 = dma.done.wait (%p2084_p12), [#allocation9], 512   ;;  %p2085_p8 = pmov %p2082_p6 }
  0xb3   : > { %p2086_p5 = pmov %p2082_p6 }
  0xb4   : > { %1590 = vsyncadd (%p2085_p8), [#allocation9], 4294966784 }
  0xb5   : > { %1592 = dma.done.wait (%p2086_p5), [#allocation12], 16   ;;  %p2087_p9 = pmov %p2086_p5 }
  0xb6   : > { %vm337_vm0 = vcmask 261120   ;;  %v335_v0 = vld [vmem:[%s285_s8] sm:$0xf]  ;;  %v1343_v8 = vld [vmem:[#allocation8] sm:$0xff]   ;;  %v1623_v9 = vmov 0.0   ;;  %vm1624_vm1 = vmmov 0   ;;  %v428_v39 = vlaneseq }
  0xb7   : > { %1594 = vsyncadd (%p2087_p9), [#allocation12], 4294967280  ;;  %v1933_v1 = vunpack.c.l.bf16 %v335_v0  ;;  %1164 = vmatprep.subr.bf16.mxu0 %v1623_v9  ;;  %1168 = vmatprep.mubr.msk.bf16.mxu0 %vm1624_vm1, %v1623_v9  ;;  %v1344_v10 = vld [vmem:[#allocation8 + $0x8] sm:$0xff]   ;;  %v1121_v15 = vld [vmem:[#allocation5] ss:$0 sm:$0xff]  ;;  %s1625_s28 = smov 96  }
  0xb8   : > { %1165 = vmatpush3.bf16.msra.mxu0 %v1343_v8  ;;  %1172 = vmatprep.subr.bf16.mxu1 %v1623_v9  ;;  %v1122_v17 = vld [vmem:[#allocation7] ss:$0 sm:$0xff]  ;;  %s1626_s26 = smov 120   ;;  %s1627_s12 = smov 88   ;;  %vm439_vm2 = vcmask 64512   ;;  %v429_v40 = vshrl.u32 %v428_v39, 7 }
  0xb9   : > { %v338_v2 = vsel %vm337_vm0, %v1933_v1, 0.0  ;;  %1166 = vmatprep.subr.bf16.mxu0 %v1623_v9  ;;  %1174 = vmatprep.mubr.msk.bf16.mxu1 %vm1624_vm1, %v1623_v9  ;;  %s1628_s16 = smov 80   ;;  %s1629_s17 = smov 112   ;;  %v431_v41 = vand.u32 127, %v428_v39  ;;  %vm504_vm4 = vcmask 1043456   ;;  %vm895_vm5 = vcmask 130048  }
  0xba   : > { %339 = vadd.xlane.f32.xlu0 %v338_v2  ;;  %s1630_s19 = smov 72   ;;  %s1631_s10 = smov 104   ;;  %vm897_vm6 = vcmask 195584   ;;  %vm969_vm7 = vcmask 257024  }
  0xbb   : > { %vm432_vm3 = vcmp.le.s32.totalorder %v431_v41, %v429_v40  ;;  %s1632_s18 = smov 64   ;;  %s1633_s11 = smov 56  }
  0xbc   : > { %1167 = vmatpush3.bf16.msra.mxu0 %v1344_v10  ;;  %s1634_s30 = smov 48   ;;  %s1635_s13 = smov 40  }
  0xbd   : > { %1178 = vmatprep.subr.bf16.mxu0 %v1623_v9  ;;  %s1636_s29 = smov 8   ;;  %s1637_s8 = smov 16  }
  0xbe   : > { %p2088_p10 = scmp.ne.s32.totalorder %s2078_s25, 0 }
 0x147   : > { %v340_v3 = vpop.xlane.xlu0 %339 }
 0x148   : > { %v342_v4 = vmul.f32 0.03125, %v340_v3 }
 0x14a   : > { %v343_v5 = vsub.f32 %v1933_v1, %v342_v4 }
 0x14c   : > { %v344_v6 = vmul.f32 %v343_v5, %v343_v5 }
 0x14e   : > { %v345_v7 = vsel %vm337_vm0, %v344_v6, 0.0 }
 0x14f   : > { %346 = vadd.xlane.f32.xlu0 %v345_v7 }
 0x1dc   : > { %v347_v11 = vpop.xlane.xlu0 %346 }
 0x1dd   : > { %v348_v12 = vmul.f32 0.03125, %v347_v11 }
 0x1df   : > { %v349_v13 = vadd.f32 1e-05, %v348_v12 }
 0x1e1   : > { %1347 = vrsqrt.f32 %v349_v13 }
 0x1eb   : > { %v1348_v14 = vpop.eup %1347 }
 0x1ec   : > { %v351_v16 = vmul.f32 %v1348_v14, %v343_v5 }
 0x1ee   : > { %v359_v18 = vmul.f32 %v1121_v15, %v351_v16 }
 0x1f0   : > { %v367_v19 = vadd.f32 %v1122_v17, %v359_v18 }
 0x1f2   : > { %v368_v20 = vpack.c.bf16 %v367_v19, %v367_v19 }
 0x1f4   : > { %1169 = vmatmul.mubr.msk.bf16.vlgmr.msra.gmra.mrb[0].mxu0 %vm337_vm0, %v368_v20 }
 0x1f5   : > { %1180 = vmatprep.mubr.msk.bf16.mxu0 %vm1624_vm1, %v1623_v9 }
 0x2c7   : > { %v422_v21 = vpop.f32.mrb[0].mxu0 }
 0x2c8   : > { %v433_v22 = vmul.f32 0.35355338, %v422_v21  ;;  %v1950_v23 = vpack.c.bf16 %v422_v21, %v422_v21  ;;  %v1170_v24 = vpop.f32.mrb[1].mxu0 }
 0x2c9   : > { %v425_v25 = vpop.f32.mrb[2].mxu0 }
 0x2ca   : > { %v434_v26 = vpack.c.bf16 %v433_v22, %v433_v22  ;;  %437 = vrot.lane.b32.xlu1 %v1950_v23, %s1625_s28  ;;  %v1171_v27 = vpop.f32.mrb[3].mxu0  ;;  %s1638_s28 = smov 24  }
 0x2cc   : > { %549 = vrot.lane.b32.xlu0 %v434_v26, %s1626_s26  ;;  %s1139_s26 = sshll.u32 %s1696_s27, 6 }
 0x2ce   : > { %551 = vrot.lane.b32.xlu1 %v1950_v23, %s1627_s12  ;;  %s333_s12 = scalar_lea.vmem [#allocation13], %s1114_s9  ;;  %s1639_s9 = smov [#allocation13]  }
 0x2d2   : > { %662 = vrot.lane.b32.xlu1 %v1950_v23, %s1628_s16  ;;  %s985_s16 = sshll.u32 %s333_s12, 4  ;;  %s2021_s16 = int_to_ptr.vmem [resolvable:$true] %s985_s16 }
 0x2d3   : > { %s1535_s27 = scalar_lea.vmem %s2021_s16, 64 }
 0x2d4   : > { %p1536_p7 = scmp.ne.s32.totalorder %s2021_s16, %s1535_s27 }
 0x2d6   : > { %660 = vrot.lane.b32.xlu1 %v434_v26, %s1629_s17  ;;  %p1537_p4 = pnand %p1536_p7, %p2088_p10 }
 0x2d8   : > { %p1538_p1 = pneg %p1537_p4 }
 0x2da   : > { %773 = vrot.lane.b32.xlu1 %v1950_v23, %s1630_s19 }
 0x2de   : > { %771 = vrot.lane.b32.xlu1 %v434_v26, %s1631_s10  ;;  %s2019_s10 = scalar_lea.hbm %s2069_s6, %s1139_s26 }
 0x33c   : > { %v438_v28 = vpop.permute.xlu1 %437 }
 0x33d   : > { %v444_v29 = vsel %vm439_vm2, %v438_v28, 0 }
 0x33e   : > { %1173 = vmatpush3.bf16.xpose.msra.mxu1 %v444_v29  ;;  %v550_v33 = vpop.permute.xlu0 %549 }
 0x33f   : > { %1184 = vmatprep.subr.bf16.mxu1 %v1623_v9 }
 0x340   : > { %v552_v30 = vpop.permute.xlu1 %551 }
 0x341   : > { %v557_v31 = vsel %vm439_vm2, %v552_v30, 0 }
 0x344   : > { %v663_v32 = vpop.permute.xlu1 %662 }
 0x345   : > { %1175 = vmatmul.mubr.msk.bf16.vlgmr.msra.gmra.mrb[0].mxu1 %vm439_vm2, %v434_v26  ;;  %v668_v35 = vsel %vm439_vm2, %v663_v32, 0 }
 0x346   : > { %1185 = vmatpush3.bf16.xpose.msra.mxu1 %v557_v31  ;;  %1186 = vmatprep.mubr.msk.bf16.mxu1 %vm1624_vm1, %v1623_v9 }
 0x347   : > { %1196 = vmatprep.subr.bf16.mxu1 %v1623_v9 }
 0x348   : > { %v661_v34 = vpop.permute.xlu1 %660 }
 0x34c   : > { %v774_v36 = vpop.permute.xlu1 %773 }
 0x34d   : > { %1187 = vmatmul.mubr.msk.bf16.vlgmr.msra.gmra.mrb[4].mxu1 %vm439_vm2, %v550_v33  ;;  %v779_v37 = vsel %vm439_vm2, %v774_v36, 0 }
 0x34e   : > { %1197 = vmatpush3.bf16.xpose.msra.mxu1 %v668_v35  ;;  %1198 = vmatprep.mubr.msk.bf16.mxu1 %vm1624_vm1, %v1623_v9 }
 0x34f   : > { %1208 = vmatprep.subr.bf16.mxu1 %v1623_v9 }
 0x350   : > { %v772_v38 = vpop.permute.xlu1 %771 }
 0x355   : > { %1199 = vmatmul.mubr.msk.bf16.vlgmr.msra.gmra.mrb[8].mxu1 %vm439_vm2, %v661_v34 }
 0x356   : > { %1209 = vmatpush3.bf16.xpose.msra.mxu1 %v779_v37  ;;  %1210 = vmatprep.mubr.msk.bf16.mxu1 %vm1624_vm1, %v1623_v9 }
 0x357   : > { %1220 = vmatprep.subr.bf16.mxu1 %v1623_v9 }
 0x35d   : > { %1211 = vmatmul.mubr.msk.bf16.vlgmr.msra.gmra.mrb[12].mxu1 %vm439_vm2, %v772_v38 }
 0x35e   : > { %1224 = vmatprep.mubr.msk.bf16.mxu1 %vm1624_vm1, %v1623_v9 }
 0x418   : > { %v480_v42 = vpop.f32.mrb[0].mxu1 }
 0x419   : > { %v486_v43 = vsel %vm432_vm3, %v480_v42, -1e+30  ;;  %v1176_v44 = vpop.f32.mrb[1].mxu1 }
 0x41a   : > { %v483_v45 = vpop.f32.mrb[2].mxu1  ;;  %v487_v46 = vsel %vm439_vm2, %v486_v43, -inf }
 0x41b   : > { %488 = vmax.xlane.f32.xlu1 %v487_v46  ;;  %v1177_v47 = vpop.f32.mrb[3].mxu1 }
 0x420   : > { %v593_v48 = vpop.f32.mrb[4].mxu1 }
 0x421   : > { %v599_v49 = vsel %vm432_vm3, %v593_v48, -1e+30  ;;  %v1188_v50 = vpop.f32.mrb[5].mxu1 }
 0x422   : > { %v596_v51 = vpop.f32.mrb[6].mxu1  ;;  %v600_v52 = vsel %vm439_vm2, %v599_v49, -inf }
 0x423   : > { %601 = vmax.xlane.f32.xlu0 %v600_v52  ;;  %v1189_v53 = vpop.f32.mrb[7].mxu1 }
 0x428   : > { %v704_v54 = vpop.f32.mrb[8].mxu1 }
 0x429   : > { %v710_v55 = vsel %vm432_vm3, %v704_v54, -1e+30  ;;  %v1200_v56 = vpop.f32.mrb[9].mxu1 }
 0x42a   : > { %v707_v57 = vpop.f32.mrb[10].mxu1  ;;  %v711_v58 = vsel %vm439_vm2, %v710_v55, -inf  ;;  %v1345_v56 = vld [vmem:[#allocation10] sm:$0xff]  }
 0x42b   : > { %712 = vmax.xlane.f32.xlu1 %v711_v58  ;;  %v1201_v59 = vpop.f32.mrb[11].mxu1  ;;  %1221 = vmatpush3.bf16.msra.mxu1 %v1345_v56  ;;  %v1346_v57 = vld [vmem:[#allocation10 + $0x8] sm:$0xff]  }
 0x42c   : > { %1222 = vmatprep.subr.bf16.mxu1 %v1623_v9 }
 0x42f   : > { %1223 = vmatpush3.bf16.msra.mxu1 %v1346_v57 }
 0x430   : > { %v815_v60 = vpop.f32.mrb[12].mxu1 }
 0x431   : > { %v821_v61 = vsel %vm432_vm3, %v815_v60, -1e+30  ;;  %v1212_v62 = vpop.f32.mrb[13].mxu1 }
 0x432   : > { %v818_v63 = vpop.f32.mrb[14].mxu1  ;;  %v822_v0 = vsel %vm439_vm2, %v821_v61, -inf }
 0x433   : > { %823 = vmax.xlane.f32.xlu0 %v822_v0  ;;  %v1213_v2 = vpop.f32.mrb[15].mxu1 }
 0x4a8   : > { %v489_v3 = vpop.xlane.xlu1 %488 }
 0x4a9   : > { %v490_v4 = vsub.f32 %v486_v43, %v489_v3 }
 0x4ab   : > { %v491_v5 = vmul.f32 1.442695, %v490_v4 }
 0x4ad   : > { %1349 = vpow2.f32 %v491_v5 }
 0x4b0   : > { %v602_v6 = vpop.xlane.xlu0 %601 }
 0x4b1   : > { %v603_v7 = vsub.f32 %v599_v49, %v602_v6 }
 0x4b3   : > { %v604_v8 = vmul.f32 1.442695, %v603_v7 }
 0x4b5   : > { %1351 = vpow2.f32 %v604_v8 }
 0x4b7   : > { %v1350_v10 = vpop.eup %1349 }
 0x4b8   : > { %v493_v11 = vsel %vm439_vm2, %v1350_v10, 0.0  ;;  %v713_v19 = vpop.xlane.xlu1 %712 }
 0x4b9   : > { %494 = vadd.xlane.f32.xlu1 %v493_v11  ;;  %v714_v20 = vsub.f32 %v710_v55, %v713_v19  ;;  %v1137_v11 = vld [vmem:[#allocation11] ss:$0 sm:$0xff] }
 0x4bb   : > { %v715_v21 = vmul.f32 1.442695, %v714_v20 }
 0x4bf   : > { %v1352_v12 = vpop.eup %1351 }
 0x4c0   : > { %v824_v13 = vpop.xlane.xlu0 %823  ;;  %v606_v14 = vsel %vm439_vm2, %v1352_v12, 0.0 }
 0x4c1   : > { %v825_v15 = vsub.f32 %v821_v61, %v824_v13  ;;  %607 = vadd.xlane.f32.xlu0 %v606_v14 }
 0x4c3   : > { %v826_v16 = vmul.f32 1.442695, %v825_v15 }
 0x4c5   : > { %1353 = vpow2.f32 %v826_v16 }
 0x4c6   : > { %1355 = vpow2.f32 %v715_v21 }
 0x4ca   : > { %499 = vrot.lane.b32.xlu1 %v1950_v23, %s1632_s18  ;;  %s972_s18 = scalar_lea.sflag [#allocation4], %s1911_s15 }
 0x4cf   : > { %v1354_v17 = vpop.eup %1353 }
 0x4d0   : > { %v828_v18 = vsel %vm439_vm2, %v1354_v17, 0.0  ;;  %v1356_v22 = vpop.eup %1355 }
 0x4d1   : > { %829 = vadd.xlane.f32.xlu0 %v828_v18  ;;  %v717_v24 = vsel %vm439_vm2, %v1356_v22, 0.0 }
 0x4e7   : > { %612 = vrot.lane.b32.xlu0 %v1950_v23, %s1633_s11  ;;  %s1539_s11 = sshll.u32 %s1639_s9, 4  ;;  %s1540_s11 = int_to_ptr.vmem [resolvable:$false] %s1539_s11 }
 0x4e8   : > { %p1542_p13 = scmp.lt.s32.totalorder %s2021_s16, %s1540_s11 }
 0x4ee   : > { %718 = vadd.xlane.f32.xlu1 %v717_v24 }
 0x4ff   : > { %723 = vrot.lane.b32.xlu1 %v1950_v23, %s1634_s30  ;;  %s1541_s30 = scalar_lea.vmem %s1540_s11, 128 }
 0x500   : > { %p1543_p0 = scmp.lt.s32.totalorder %s1541_s30, %s1535_s27 }
 0x502   : > { %p1544_p2 = por %p1543_p0, %p1542_p13 }
 0x503   : > { %834 = vrot.lane.b32.xlu1 %v1950_v23, %s1635_s13 }
 0x504   : > { %p1545_p3 = pnand %p1544_p2, %p1538_p1 }
 0x546   : > { %v495_v25 = vpop.xlane.xlu1 %494 }
 0x547   : > { %1357 = vrcp.f32 %v495_v25 }
 0x54a   : > { %v500_v26 = vpop.permute.xlu1 %499 }
 0x54b   : > { %v506_v27 = vsel %vm504_vm4, %v500_v26, 0 }
 0x54c   : > { %1179 = vmatpush3.bf16.msra.mxu0 %v506_v27 }
 0x54d   : > { %1190 = vmatprep.subr.bf16.mxu0 %v1623_v9 }
 0x54e   : > { %v608_v29 = vpop.xlane.xlu0 %607 }
 0x54f   : > { %1359 = vrcp.f32 %v608_v29 }
 0x551   : > { %v1358_v28 = vpop.eup %1357 }
 0x552   : > { %v497_v30 = vmul.f32 %v1358_v28, %v1350_v10 }
 0x554   : > { %v498_v31 = vpack.c.bf16 %v497_v30, %v497_v30 }
 0x556   : > { %1181 = vmatmul.mubr.msk.bf16.vlgmr.msra.gmra.mrb[4].mxu0 %vm439_vm2, %v498_v31 }
 0x557   : > { %1192 = vmatprep.mubr.msk.bf16.mxu0 %vm1624_vm1, %v1623_v9 }
 0x559   : > { %v1360_v23 = vpop.eup %1359 }
 0x55a   : > { %v610_v33 = vmul.f32 %v1360_v23, %v1352_v12 }
 0x55c   : > { %v611_v36 = vpack.c.bf16 %v610_v33, %v610_v33 }
 0x55e   : > { %v830_v32 = vpop.xlane.xlu0 %829 }
 0x562   : > { %v613_v34 = vpop.permute.xlu0 %612 }
 0x563   : > { %v618_v35 = vsel %vm504_vm4, %v613_v34, 0 }
 0x564   : > { %1191 = vmatpush3.bf16.msra.mxu0 %v618_v35 }
 0x565   : > { %1202 = vmatprep.subr.bf16.mxu0 %v1623_v9 }
 0x567   : > { %1193 = vmatmul.mubr.msk.bf16.vlgmr.msra.gmra.mrb[8].mxu0 %vm439_vm2, %v611_v36 }
 0x568   : > { %1204 = vmatprep.mubr.msk.bf16.mxu0 %vm1624_vm1, %v1623_v9 }
 0x57b   : > { %v719_v37 = vpop.xlane.xlu1 %718 }
 0x57c   : > { %1361 = vrcp.f32 %v719_v37 }
 0x57d   : > { %1363 = vrcp.f32 %v830_v32 }
 0x57f   : > { %v724_v38 = vpop.permute.xlu1 %723 }
 0x580   : > { %v729_v39 = vsel %vm504_vm4, %v724_v38, 0 }
 0x581   : > { %1203 = vmatpush3.bf16.msra.mxu0 %v729_v39 }
 0x582   : > { %1214 = vmatprep.subr.bf16.mxu0 %v1623_v9 }
 0x583   : > { %v835_v42 = vpop.permute.xlu1 %834 }
 0x584   : > { %v840_v45 = vsel %vm504_vm4, %v835_v42, 0 }
 0x586   : > { %v1362_v40 = vpop.eup %1361 }
 0x587   : > { %v721_v41 = vmul.f32 %v1362_v40, %v1356_v22  ;;  %v1364_v44 = vpop.eup %1363 }
 0x588   : > { %v832_v46 = vmul.f32 %v1364_v44, %v1354_v17 }
 0x589   : > { %v722_v43 = vpack.c.bf16 %v721_v41, %v721_v41 }
 0x58a   : > { %v833_v47 = vpack.c.bf16 %v832_v46, %v832_v46 }
 0x58b   : > { %1205 = vmatmul.mubr.msk.bf16.vlgmr.msra.gmra.mrb[12].mxu0 %vm439_vm2, %v722_v43 }
 0x58c   : > { %1215 = vmatpush3.bf16.msra.mxu0 %v840_v45  ;;  %1216 = vmatprep.mubr.msk.bf16.mxu0 %vm1624_vm1, %v1623_v9 }
 0x593   : > { %1217 = vmatmul.mubr.msk.bf16.vlgmr.msra.gmra.mrb[16].mxu0 %vm439_vm2, %v833_v47 }
 0x629   : > { %v542_v48 = vpop.f32.mrb[4].mxu0 }
 0x62a   : > { %v1182_v49 = vpop.f32.mrb[5].mxu0 }
 0x62b   : > { %v545_v50 = vpop.f32.mrb[6].mxu0 }
 0x62c   : > { %v1183_v51 = vpop.f32.mrb[7].mxu0 }
 0x63a   : > { %v654_v52 = vpop.f32.mrb[8].mxu0 }
 0x63b   : > { %883 = vrot.lane.b32.xlu0 %v654_v52, %s1636_s29  ;;  %v1194_v53 = vpop.f32.mrb[9].mxu0 }
 0x63c   : > { %v657_v54 = vpop.f32.mrb[10].mxu0 }
 0x63d   : > { %v1195_v55 = vpop.f32.mrb[11].mxu0 }
 0x65e   : > { %v765_v58 = vpop.f32.mrb[12].mxu0 }
 0x65f   : > { %887 = vrot.lane.b32.xlu1 %v765_v58, %s1637_s8  ;;  %v1206_v59 = vpop.f32.mrb[13].mxu0 }
 0x660   : > { %v768_v60 = vpop.f32.mrb[14].mxu0 }
 0x661   : > { %v1207_v61 = vpop.f32.mrb[15].mxu0 }
 0x666   : > { %v876_v62 = vpop.f32.mrb[16].mxu0 }
 0x667   : > { %891 = vrot.lane.b32.xlu0 %v876_v62, %s1638_s28  ;;  %v1218_v63 = vpop.f32.mrb[17].mxu0 }
 0x668   : > { %v879_v0 = vpop.f32.mrb[18].mxu0 }
 0x669   : > { %v1219_v2 = vpop.f32.mrb[19].mxu0 }
 0x6ad   : > { %v884_v3 = vpop.permute.xlu0 %883 }
 0x6ae   : > { %v894_v9 = vsel %vm439_vm2, %v542_v48, %v884_v3 }
 0x6d1   : > { %v888_v4 = vpop.permute.xlu1 %887 }
 0x6d2   : > { %v896_v5 = vsel %vm895_vm5, %v894_v9, %v888_v4 }
 0x6d9   : > { %v892_v6 = vpop.permute.xlu0 %891 }
 0x6da   : > { %v898_v7 = vsel %vm897_vm6, %v896_v5, %v892_v6 }
 0x6db   : > { %v899_v8 = vpack.c.bf16 %v898_v7, %v898_v7 }
 0x6dd   : > { %1225 = vmatmul.mubr.msk.bf16.vlgmr.msra.gmra.mrb[16].mxu1 %vm337_vm0, %v899_v8 }
 0x7b0   : > { %v953_v10 = vpop.f32.mrb[16].mxu1 }
 0x7b1   : > { %v959_v12 = vadd.f32 %v953_v10, %v1933_v1  ;;  %v1226_v13 = vpop.f32.mrb[17].mxu1 }
 0x7b2   : > { %v956_v14 = vpop.f32.mrb[18].mxu1 }
 0x7b3   : > { %v967_v15 = vadd.f32 %v1137_v11, %v959_v12  ;;  %v1227_v16 = vpop.f32.mrb[19].mxu1 }
 0x7b5   : > { %v968_v17 = vpack.c.bf16 %v967_v15, %v967_v15 }
 0x7b7   : > { %970 = vst.msk [vmem:[%s333_s12] sm:$0xf] %vm969_vm7, %v968_v17 }
 0x7b8   : > { %1548 = shalt.err (!%p1545_p3)
}
 0x7b9   : > { %s1549_s15 = scalar_lea.hbm %s2019_s10, 64  ;;  %s1553_s8 = scalar_lea.hbm %s2069_s6, 128 }
 0x7ba   : > { %p1550_p6 = scmp.ne.s32.totalorder %s2019_s10, %s1549_s15  ;;  %p1554_p8 = scmp.lt.u32.totalorder %s2019_s10, %s2069_s6 }
 0x7bb   : > { %p1555_p5 = scmp.lt.u32.totalorder %s1553_s8, %s1549_s15  ;;  %p1557_p7 = scmp.lt.u32.totalorder %s1549_s15, %s2019_s10 }
 0x7bc   : > { %p1551_p11 = pnand %p1550_p6, %p2088_p10 }
 0x7bd   : > { %p1556_p9 = por %p1555_p5, %p1554_p8 }
 0x7be   : > { %p1552_p12 = pneg %p1551_p11 }
 0x7bf   : > { %p1558_p4 = por %p1557_p7, %p1556_p9 }
 0x7c1   : > { %p1559_p1 = pnand %p1558_p4, %p1552_p12 }
 0x7c3   : > { %1562 = shalt.err (!%p1559_p1)
}
 0x7c4   : > { %1250 = dma.vmem_to_hbm [thread:$0]  (%p2088_p10), %s2021_s16, 64, %s2019_s10, %s972_s18  }
 0x7c5 PF: > { %s997_s12 = sand.u32 1, %s1601_s21   ;;  %p2089_p13 = scmp.ne.s32.totalorder %s2079_s20, 0 }
 0x7c6   : > { %p2090_p0 = scmp.ge.s32.totalorder %s1613_s24, 2  ;;  %s998_s17 = scalar_lea.sflag [#allocation4], %s997_s12 }
 0x7c8   : > { %p1273_p2 = pnand %p2090_p0, %p2089_p13 }
 0x7ca   : > { %1596 = dma.done.wait (!%p1273_p2), %s998_s17, 64  }
 0x7cb   : > { %1598 = vsyncadd (!%p1273_p2), %s998_s17, 4294967232  ;;  %p22_p3 = scmp.ge.s32.totalorder %s1841_s7, 4   ;;  %s2091_s21 = smov %s1605_s22 }
 0x7cc   : > { %s2092_s22 = smov %s1609_s23  ;;  %s2093_s23 = smov %s1853_s14 }
 0x7cd   : > { %s2094_s24 = smov %s1841_s7  ;;  %24 = sbr.rel (!%p22_p3) target bundleno = 8 (0x8), region = 109 }
 0x7d4   :  { %1003 = vsyncpa [#allocation3], 1 }
 0x7d5   :  { %1005 = vsyncpa [#allocation3 + $0x1], 1 }
 0x7d6   :  { %1006 = vsyncpa [#allocation6], 1 }
 0x7d7   :  { %1007 = vsyncpa [#allocation9], 1 }
 0x7d8   :  { %1008 = vsyncpa [#allocation12], 1 }
 0x7d9   :  { %1009 = vsyncpa [#allocation4], 1 }
 0x7da   :  { %1011 = vsyncpa [#allocation4 + $0x1], 1 }

</bundles_post_ra>
